<compile_context>
chip_gen: v7x
topology: tpu7x:2x2x1
jax: 0.10.0
libtpu: 0.0.40
codegen_flags: <defaults>
</compile_context>

<pallas_src>
import functools

import jax
import jax.numpy as jnp
from jax import lax
from jax.experimental import pallas as pl
from jax.experimental.pallas import tpu as pltpu

NUM_OBSERVATIONS = 6
DIM = 32
DEPTH = 3
SCALE = 1.0
LEAKY_SLOPE = 0.01  # torch.nn.LeakyReLU default negative_slope


def _round_up(x, m):
    return pl.cdiv(x, m) * m


def _critic_kernel(x_ref, w1_ref, b1_ref, w2_ref, b2_ref, w3_ref, b3_ref, o_ref,
                   *, scale):
    # x_ref: (tb, F) batch-on-sublanes block, fed straight from HBM (no wrapper
    # transpose). The first dot contracts the minor feature axis of x, so from
    # layer 1 onward the batch sits on lanes -> lane-dense activations + output.
    x = x_ref[...]
    cdt = x.dtype  # MXU operand dtype (f32 or bf16); accumulation stays f32

    # Layer 1: (DIM, F) . (tb, F)^T -> (DIM, tb), then LeakyReLU.
    h = lax.dot_general(w1_ref[...], x, (((1,), (1,)), ((), ())),
                        preferred_element_type=jnp.float32)
    h = h + b1_ref[...]
    h = jnp.maximum(h, LEAKY_SLOPE * h)

    # Layer 2: (DIM, DIM) @ (DIM, tb) -> (DIM, tb), then LeakyReLU.
    h = jnp.dot(w2_ref[...], h.astype(cdt),
                preferred_element_type=jnp.float32) + b2_ref[...]
    h = jnp.maximum(h, LEAKY_SLOPE * h)

    # Layer 3: (1, DIM) @ (DIM, tb) -> (1, tb). w3/b3 arrive pre-negated (tanh is
    # odd; scale is applied after tanh, so the fold holds for negative scale too).
    # NOTE: weights are grid-resident (constant index_map); Mosaic should push each
    # into the MXU once per tile. If a bundle dump ever shows per-128-lane-chunk
    # re-pushes, switch to explicit pltpu.matmul_push_rhs / matmul_acc_lhs.
    h = jnp.dot(w3_ref[...], h.astype(cdt),
                preferred_element_type=jnp.float32) + b3_ref[...]
    h = jnp.tanh(h)
    if scale != 1.0:
        h = h * scale
    o_ref[...] = h.astype(o_ref.dtype)


def _prep_params(params, num_features, dtype):
    """PyTorch-style (in, out) params -> kernel layout (out-major, fused negation)."""
    w1, b1, w2, b2, w3, b3 = params
    # Zero-pad w1 over the feature axis so the full observation (incl. the 2 trailing
    # features the module drops) can be fed in; padded columns contribute exactly 0.
    w1t = jnp.zeros((DIM, num_features), dtype).at[:, : w1.shape[0]].set(
        w1.T.astype(dtype))
    b1t = b1.reshape(DIM, 1).astype(jnp.float32)
    w2t = w2.T.astype(dtype)                    # (DIM, DIM)
    b2t = b2.reshape(DIM, 1).astype(jnp.float32)
    w3t = (-w3.T).astype(dtype)                 # (1, DIM)  negation folded
    b3t = (-b3).reshape(1, 1).astype(jnp.float32)
    return w1t, b1t, w2t, b2t, w3t, b3t


def critic_forward(observation, params, *, scale=SCALE, block_b=8192,
                   min_split=1024):
    B, F = observation.shape
    cdt = observation.dtype  # bf16 in -> bf16 MXU operands; f32 in -> f32
    w1t, b1t, w2t, b2t, w3t, b3t = _prep_params(params, F, cdt)

    # Balanced batch tiling: as few blocks as possible (amortizes ~0.35 us/step),
    # but at least 2 once B >= min_split so both v7x TensorCores get work.
    # Each tile is a multiple of 128 lanes.
    num_blocks = pl.cdiv(B, block_b)
    if B >= min_split:
        num_blocks = max(num_blocks, 2)
    tb = _round_up(pl.cdiv(B, num_blocks), 128)
    b_pad = num_blocks * tb

    # Row-only pad (no transpose). No-op whenever B % (128 * num_blocks) == 0,
    # which is the perf-relevant case; otherwise a cheap (B, F) pad pass.
    x_in = observation if b_pad == B else jnp.pad(
        observation, ((0, b_pad - B), (0, 0)))

    itemsize = jnp.dtype(cdt).itemsize
    flops = 2 * b_pad * (DIM * F + DIM * DIM + DIM)
    bytes_accessed = (b_pad * F * itemsize                        # x
                      + (DIM * F + DIM * DIM + DIM) * itemsize    # weights
                      + (2 * DIM + 1) * 4                         # biases (f32)
                      + b_pad * 4)                                # output (f32)

    out = pl.pallas_call(
        functools.partial(_critic_kernel, scale=scale),
        out_shape=jax.ShapeDtypeStruct((1, b_pad), jnp.float32),
        grid=(num_blocks,),
        in_specs=[
            pl.BlockSpec((tb, F), lambda i: (i, 0)),      # x block (batch tiled)
            pl.BlockSpec((DIM, F), lambda i: (0, 0)),     # w1 (resident)
            pl.BlockSpec((DIM, 1), lambda i: (0, 0)),     # b1
            pl.BlockSpec((DIM, DIM), lambda i: (0, 0)),   # w2
            pl.BlockSpec((DIM, 1), lambda i: (0, 0)),     # b2
            pl.BlockSpec((1, DIM), lambda i: (0, 0)),     # w3 (negated)
            pl.BlockSpec((1, 1), lambda i: (0, 0)),       # b3 (negated)
        ],
        out_specs=pl.BlockSpec((1, tb), lambda i: (0, i)),
        compiler_params=pltpu.CompilerParams(
            dimension_semantics=("parallel",),
            # (tb, F) tiles pad F=8 lanes up to 128 in VMEM (~4 MiB/buffer at
            # tb=8192, double-buffered), so keep generous scoped-VMEM headroom.
            vmem_limit_bytes=48 * 1024 * 1024),
        cost_estimate=pl.CostEstimate(flops=flops, transcendentals=b_pad,
                                      bytes_accessed=bytes_accessed),
    )(x_in, w1t, b1t, w2t, b2t, w3t, b3t)

    # (1, B_pad) lane-dense slab -> (B, 1) like the PyTorch module.
    return out[0, :B][:, None]


def init_params(key):
    """Deterministic parameter init (PyTorch Linear shapes, stored as (in, out))."""
    ks = jax.random.split(key, 6)

    def uniform(k, shape, fan_in):
        bound = 1.0 / jnp.sqrt(fan_in)
        return jax.random.uniform(k, shape, jnp.float32, -bound, bound)

    w1 = uniform(ks[0], (NUM_OBSERVATIONS, DIM), NUM_OBSERVATIONS)
    b1 = uniform(ks[1], (1, DIM), NUM_OBSERVATIONS)
    w2 = uniform(ks[2], (DIM, DIM), DIM)
    b2 = uniform(ks[3], (1, DIM), DIM)
    w3 = uniform(ks[4], (DIM, 1), DIM)
    b3 = uniform(ks[5], (1, 1), DIM)
    return (w1, b1, w2, b2, w3, b3)


def critic_ref(observation, params, *, scale=SCALE):
    """Pure-JAX reference of the PyTorch forward, for verification."""
    w1, b1, w2, b2, w3, b3 = params
    x = observation[:, :-2]
    h = x @ w1 + b1
    h = jnp.where(h >= 0, h, LEAKY_SLOPE * h)
    h = h @ w2 + b2
    h = jnp.where(h >= 0, h, LEAKY_SLOPE * h)
    h = h @ w3 + b3
    h = jnp.tanh(h) * scale
    return -h


if __name__ == "__main__":
    key = jax.random.PRNGKey(0)
    k_params, k_obs, k_obs2 = jax.random.split(key, 3)

    params = init_params(k_params)

    # Small f32 case (tight check). Observation has num_observations + 2 features;
    # the module drops the last 2 (handled by zero-padded w1 columns in the kernel).
    B = 8
    obs_f32 = jax.random.normal(k_obs, (B, NUM_OBSERVATIONS + 2), jnp.float32)
    out = jax.block_until_ready(critic_forward(obs_f32, params))
    ref = critic_ref(obs_f32, params)
    assert out.shape == (B, 1)
    assert jnp.allclose(out, ref, atol=1e-5, rtol=1e-5), "f32 mismatch vs reference"

    # Larger bf16-operand case (exercises the multi-block / megacore path and the
    # bf16 MXU-operand path); compared against the f32 reference with loose tol.
    B2 = 4096
    obs_big_f32 = jax.random.normal(k_obs2, (B2, NUM_OBSERVATIONS + 2), jnp.float32)
    obs_big_bf16 = obs_big_f32.astype(jnp.bfloat16)
    out2 = jax.block_until_ready(critic_forward(obs_big_bf16, params))
    ref2 = critic_ref(obs_big_bf16.astype(jnp.float32), params)
    assert out2.shape == (B2, 1)
    assert jnp.allclose(out2, ref2, atol=5e-2, rtol=5e-2), "bf16 mismatch vs reference"

    print("KERNEL_OK")
</pallas_src>

<mosaic_0001>
module attributes {stable_mosaic.version = 11 : i64} {
  func.func @_critic_kernel(%arg0: i32, %arg1: memref<128x8xf32, #tpu.memory_space<vmem>>, %arg2: memref<32x8xf32, #tpu.memory_space<vmem>>, %arg3: memref<32x1xf32, #tpu.memory_space<vmem>>, %arg4: memref<32x32xf32, #tpu.memory_space<vmem>>, %arg5: memref<32x1xf32, #tpu.memory_space<vmem>>, %arg6: memref<1x32xf32, #tpu.memory_space<vmem>>, %arg7: memref<1x1xf32, #tpu.memory_space<vmem>>, %arg8: memref<1x128xf32, #tpu.memory_space<vmem>>) attributes {dimension_semantics = [#tpu.dimension_semantics<parallel>], iteration_bounds = array<i64: 1>, scalar_prefetch = 0 : i64, scratch_operands = 0 : i64, tpu.core_type = #tpu.core_type<tc>, window_params = [{transform_indices = @transform_0, window_bounds = array<i64: 128, 8>}, {pipeline_mode = #tpu.pipeline_mode<synchronous>, transform_indices = @transform_1, window_bounds = array<i64: 32, 8>}, {pipeline_mode = #tpu.pipeline_mode<synchronous>, transform_indices = @transform_2, window_bounds = array<i64: 32, 1>}, {pipeline_mode = #tpu.pipeline_mode<synchronous>, transform_indices = @transform_3, window_bounds = array<i64: 32, 32>}, {pipeline_mode = #tpu.pipeline_mode<synchronous>, transform_indices = @transform_4, window_bounds = array<i64: 32, 1>}, {pipeline_mode = #tpu.pipeline_mode<synchronous>, transform_indices = @transform_5, window_bounds = array<i64: 1, 32>}, {pipeline_mode = #tpu.pipeline_mode<synchronous>, transform_indices = @transform_6, window_bounds = array<i64: 1, 1>}, {transform_indices = @transform_7, window_bounds = array<i64: 1, 128>}]} {
    %c0 = arith.constant 0 : index
    %c0_0 = arith.constant 0 : index
    %0 = vector.load %arg1[%c0, %c0_0] : memref<128x8xf32, #tpu.memory_space<vmem>>, vector<128x8xf32>
    %c0_1 = arith.constant 0 : index
    %c0_2 = arith.constant 0 : index
    %1 = vector.load %arg2[%c0_1, %c0_2] : memref<32x8xf32, #tpu.memory_space<vmem>>, vector<32x8xf32>
    %cst = arith.constant dense<0.000000e+00> : vector<32x128xf32>
    %2 = tpu.matmul %1, %0, %cst {dimension_numbers = #tpu.dot_dimension_numbers<[1], [1], [0], [0], [0, 0, 1, 0], [], []>} : vector<32x8xf32>, vector<128x8xf32>, vector<32x128xf32> -> vector<32x128xf32>
    %c0_3 = arith.constant 0 : index
    %c0_4 = arith.constant 0 : index
    %3 = vector.load %arg3[%c0_3, %c0_4] : memref<32x1xf32, #tpu.memory_space<vmem>>, vector<32x1xf32>
    %4 = vector.broadcast %3 : vector<32x1xf32> to vector<32x128xf32>
    %5 = arith.addf %2, %4 : vector<32x128xf32>
    %cst_5 = arith.constant 0.00999999977 : f32
    %6 = vector.broadcast %cst_5 : f32 to vector<32x128xf32>
    %7 = arith.mulf %6, %5 : vector<32x128xf32>
    %8 = arith.maximumf %5, %7 : vector<32x128xf32>
    %c0_6 = arith.constant 0 : index
    %c0_7 = arith.constant 0 : index
    %9 = vector.load %arg4[%c0_6, %c0_7] : memref<32x32xf32, #tpu.memory_space<vmem>>, vector<32x32xf32>
    %cst_8 = arith.constant dense<0.000000e+00> : vector<32x128xf32>
    %10 = tpu.matmul %9, %8, %cst_8 {dimension_numbers = #tpu.dot_dimension_numbers<[1], [0], [0], [1], [0, 0, 1, 1], [], []>} : vector<32x32xf32>, vector<32x128xf32>, vector<32x128xf32> -> vector<32x128xf32>
    %c0_9 = arith.constant 0 : index
    %c0_10 = arith.constant 0 : index
    %11 = vector.load %arg5[%c0_9, %c0_10] : memref<32x1xf32, #tpu.memory_space<vmem>>, vector<32x1xf32>
    %12 = vector.broadcast %11 : vector<32x1xf32> to vector<32x128xf32>
    %13 = arith.addf %10, %12 : vector<32x128xf32>
    %cst_11 = arith.constant 0.00999999977 : f32
    %14 = vector.broadcast %cst_11 : f32 to vector<32x128xf32>
    %15 = arith.mulf %14, %13 : vector<32x128xf32>
    %16 = arith.maximumf %13, %15 : vector<32x128xf32>
    %c0_12 = arith.constant 0 : index
    %c0_13 = arith.constant 0 : index
    %17 = vector.load %arg6[%c0_12, %c0_13] : memref<1x32xf32, #tpu.memory_space<vmem>>, vector<1x32xf32>
    %cst_14 = arith.constant dense<0.000000e+00> : vector<1x128xf32>
    %18 = tpu.matmul %17, %16, %cst_14 {dimension_numbers = #tpu.dot_dimension_numbers<[1], [0], [0], [1], [0, 0, 1, 1], [], []>} : vector<1x32xf32>, vector<32x128xf32>, vector<1x128xf32> -> vector<1x128xf32>
    %c0_15 = arith.constant 0 : index
    %c0_16 = arith.constant 0 : index
    %19 = vector.load %arg7[%c0_15, %c0_16] : memref<1x1xf32, #tpu.memory_space<vmem>>, vector<1x1xf32>
    %20 = vector.broadcast %19 : vector<1x1xf32> to vector<1x128xf32>
    %21 = arith.addf %18, %20 : vector<1x128xf32>
    %22 = math.tanh %21 : vector<1x128xf32>
    %c0_17 = arith.constant 0 : index
    %c0_18 = arith.constant 0 : index
    %23 = vector.load %arg8[%c0_17, %c0_18] : memref<1x128xf32, #tpu.memory_space<vmem>>, vector<1x128xf32>
    tpu.vector_store %arg8[%c0_17, %c0_18], %22 {strides = array<i32>} : memref<1x128xf32, #tpu.memory_space<vmem>>, vector<1x128xf32>,
    return
  }
  func.func @transform_0(%arg0: i32) -> (i32, i32) {
    %c0_i32 = arith.constant 0 : i32
    %c0_i32_0 = arith.constant 0 : i32
    return %arg0, %c0_i32 : i32, i32
  }
  func.func @transform_1(%arg0: i32) -> (i32, i32) {
    %c0_i32 = arith.constant 0 : i32
    %c0_i32_0 = arith.constant 0 : i32
    %c0_i32_1 = arith.constant 0 : i32
    return %c0_i32, %c0_i32_0 : i32, i32
  }
  func.func @transform_2(%arg0: i32) -> (i32, i32) {
    %c0_i32 = arith.constant 0 : i32
    %c0_i32_0 = arith.constant 0 : i32
    %c0_i32_1 = arith.constant 0 : i32
    return %c0_i32, %c0_i32_0 : i32, i32
  }
  func.func @transform_3(%arg0: i32) -> (i32, i32) {
    %c0_i32 = arith.constant 0 : i32
    %c0_i32_0 = arith.constant 0 : i32
    %c0_i32_1 = arith.constant 0 : i32
    return %c0_i32, %c0_i32_0 : i32, i32
  }
  func.func @transform_4(%arg0: i32) -> (i32, i32) {
    %c0_i32 = arith.constant 0 : i32
    %c0_i32_0 = arith.constant 0 : i32
    %c0_i32_1 = arith.constant 0 : i32
    return %c0_i32, %c0_i32_0 : i32, i32
  }
  func.func @transform_5(%arg0: i32) -> (i32, i32) {
    %c0_i32 = arith.constant 0 : i32
    %c0_i32_0 = arith.constant 0 : i32
    %c0_i32_1 = arith.constant 0 : i32
    return %c0_i32, %c0_i32_0 : i32, i32
  }
  func.func @transform_6(%arg0: i32) -> (i32, i32) {
    %c0_i32 = arith.constant 0 : i32
    %c0_i32_0 = arith.constant 0 : i32
    %c0_i32_1 = arith.constant 0 : i32
    return %c0_i32, %c0_i32_0 : i32, i32
  }
  func.func @transform_7(%arg0: i32) -> (i32, i32) {
    %c0_i32 = arith.constant 0 : i32
    %c0_i32_0 = arith.constant 0 : i32
    return %c0_i32, %arg0 : i32, i32
  }
}

</mosaic_0001>

<bundles_post_ra>
// kernel: tpu_custom_call.1
= control target key start
LH: loop header
LB: loop body
LE: loop exit
PB: predicated region body
PF: predicated region fallthrough
CT: control target
= control target key end

     0   :  { %s883_s0 = inlined_call_operand.vmem [shape: f32[128,8], index: 0, kind: input, shape index: {}]   ;;  %s884_s1 = inlined_call_operand.vmem [shape: f32[32,8], index: 1, kind: input, shape index: {}]   ;;  %s885_s2 = inlined_call_operand.vmem [shape: f32[32,1], index: 2, kind: input, shape index: {}]   ;;  %s886_s3 = inlined_call_operand.vmem [shape: f32[32,32], index: 3, kind: input, shape index: {}]   ;;  %s887_s4 = inlined_call_operand.vmem [shape: f32[32,1], index: 4, kind: input, shape index: {}]   ;;  %s888_s5 = inlined_call_operand.vmem [shape: f32[1,32], index: 5, kind: input, shape index: {}]   ;;  %s889_s6 = inlined_call_operand.<no memory space> [shape: f32[1,1], index: 6, kind: input, shape index: {}]   ;;  %s890_s7 = inlined_call_operand.hbm [shape: f32[1,128], index: 7, kind: output, shape index: {}]  }
   0x1   :  { %v12_v0 = vstv %s889_s6 }
   0x2   :  { %13 = vst [vmem:[#allocation2] sm:$0x1] %v12_v0 }
   0x3   :  { %v29_v1 = vld [vmem:[%s883_s0] sm:$0xff]  ;;  %v30_v2 = vld [vmem:[%s883_s0 + $0x8] sm:$0xff]  ;;  %vm73_vm0 = vcmask 64512   ;;  %v31_v3 = vld [vmem:[%s883_s0 + $0x10] sm:$0xff]  ;;  %v677_v7 = vmov 0  }
   0x4   :  { %v582_v4 = vpack.c.bf16 %v30_v2, %v29_v1  ;;  %vm736_vm1 = vmpackc.low %vm73_vm0, %vm73_vm0  ;;  %v32_v6 = vld [vmem:[%s883_s0 + $0x18] sm:$0xff]  ;;  %649 = vset.pattern.permute.xlu0 %v677_v7  ;;  %650 = vset.pattern.permute.xlu1 %v677_v7  ;;  %v45_v9 = vld [vmem:[%s884_s1] sm:$0xff] }
   0x5   :  { %v588_v8 = vpack.c.bf16 %v32_v6, %v31_v3  ;;  %v33_v10 = vld [vmem:[%s883_s0 + $0x20] sm:$0xff]  ;;  %v34_v11 = vld [vmem:[%s883_s0 + $0x28] sm:$0xff]  ;;  %551 = vmatprep.mubr.msk.f32.mxu0 %vm73_vm0, %v45_v9  ;;  %v51_v13 = vld [vmem:[%s885_s2 + $0x10] sm:$0xff] }
   0x6   :  { %584 = vmatprep.subr.msk.bf16.mxu0 %vm736_vm1, %v582_v4  ;;  %v49_v12 = vld [vmem:[%s885_s2] sm:$0xff]  ;;  %65 = vperm.xlu1 %650, %v51_v13   ;;  %v594_v14 = vpack.c.bf16 %v34_v11, %v33_v10  ;;  %v50_v15 = vld [vmem:[%s885_s2 + $0x8] sm:$0xff]  ;;  %v52_v16 = vld [vmem:[%s885_s2 + $0x18] sm:$0xff] }
   0x7   :  { %587 = vmatpush3.bf16.xpose.msk.msra.mxu0 %vm736_vm1, %v582_v4  ;;  %55 = vperm.xlu0 %649, %v49_v12  }
   0x8   :  { %590 = vmatprep.subr.msk.bf16.mxu0 %vm736_vm1, %v588_v8 }
   0x9   :  { %14 = vsyncpa [#allocation4], 0  ;;  %v231_v17 = vld [vmem:[%s887_s4] sm:$0xff]  ;;  %v35_v18 = vld [vmem:[%s883_s0 + $0x30] sm:$0xff]  ;;  %vm255_vm2 = vcmask 261120   ;;  %v678_v2 = vmov 0.0|0.0  }
   0xa   :  { %70 = vperm.xlu1 %650, %v52_v16   ;;  %v36_v19 = vld [vmem:[%s883_s0 + $0x38] sm:$0xff]  ;;  %v232_v20 = vld [vmem:[%s887_s4 + $0x8] sm:$0xff]  ;;  %v233_v22 = vld [vmem:[%s887_s4 + $0x10] sm:$0xff]  ;;  %vm679_vm3 = vmmov 0   ;;  %v680_v3 = vmov 0.0   ;;  %s681_s14 = smov [#allocation3]  }
   0xb   :  { %60 = vperm.xlu0 %649, %v50_v15   ;;  %v600_v21 = vpack.c.bf16 %v36_v19, %v35_v18  ;;  %v234_v23 = vld [vmem:[%s887_s4 + $0x18] sm:$0xff]  ;;  %v362_v24 = vld [vmem:[#allocation2] sm:$0x1]  ;;  %v38_v26 = vld [vmem:[%s883_s0 + $0x48] sm:$0xff]  ;;  %s453_s4 = sshll.u32 %s681_s14, 4  ;;  %s454_s4 = int_to_ptr.vmem [resolvable:$true] %s453_s4 }
   0xc   :  { %v37_v25 = vld [vmem:[%s883_s0 + $0x40] sm:$0xff]  ;;  %v39_v28 = vld [vmem:[%s883_s0 + $0x50] sm:$0xff]  ;;  %v40_v29 = vld [vmem:[%s883_s0 + $0x58] sm:$0xff]  ;;  %s653_s15 = scalar_lea.vmem %s454_s4, 16  ;;  %s657_s16 = scalar_lea.vmem %s454_s4, 32 }
   0xd   :  { %v606_v27 = vpack.c.bf16 %v38_v26, %v37_v25  ;;  %v612_v30 = vpack.c.bf16 %v40_v29, %v39_v28  ;;  %v41_v31 = vld [vmem:[%s883_s0 + $0x60] sm:$0xff]  ;;  %v42_v32 = vld [vmem:[%s883_s0 + $0x68] sm:$0xff]  ;;  %v43_v34 = vld [vmem:[%s883_s0 + $0x70] sm:$0xff]  ;;  %p654_p0 = scmp.ne.s32.totalorder %s454_s4, %s653_s15  ;;  %p658_p1 = scmp.lt.s32.totalorder %s454_s4, %s454_s4 }
   0xe   :  { %242 = vperm.xlu1 %650, %v232_v20   ;;  %v618_v33 = vpack.c.bf16 %v42_v32, %v41_v31  ;;  %v44_v35 = vld [vmem:[%s883_s0 + $0x78] sm:$0xff]  ;;  %v46_v37 = vld [vmem:[%s884_s1 + $0x8] sm:$0xff]  ;;  %v47_v38 = vld [vmem:[%s884_s1 + $0x10] sm:$0xff]  ;;  %p659_p2 = scmp.lt.s32.totalorder %s657_s16, %s653_s15 }
   0xf   :  { %593 = vmatpush3.bf16.xpose.msk.msra.mxu0 %vm736_vm1, %v588_v8  ;;  %237 = vperm.xlu0 %649, %v231_v17   ;;  %v624_v36 = vpack.c.bf16 %v44_v35, %v43_v34  ;;  %v48_v39 = vld [vmem:[%s884_s1 + $0x18] sm:$0xff]  ;;  %v227_v40 = vld [vmem:[%s886_s3] sm:$0xff]  ;;  %v228_v63 = vld [vmem:[%s886_s3 + $0x8] sm:$0xff] }
  0x10   :  { %596 = vmatprep.subr.msk.bf16.mxu0 %vm736_vm1, %v594_v14  ;;  %565 = vmatprep.mubr.msk.f32.mxu1 %vm255_vm2, %v227_v40  ;;  %v229_v0 = vld [vmem:[%s886_s3 + $0x10] sm:$0xff]  ;;  %v230_v1 = vld [vmem:[%s886_s3 + $0x18] sm:$0xff]  ;;  %v361_v26 = vld [vmem:[%s888_s5] sm:$0x1]  ;;  %p660_p3 = por %p659_p2, %p658_p1 }
  0x12   :  { %252 = vperm.xlu1 %650, %v234_v23   ;;  %p661_p4 = pnand %p660_p3, %p654_p0 }
  0x13   :  { %247 = vperm.xlu0 %649, %v233_v22  }
  0x17   :  { %599 = vmatpush3.bf16.xpose.msk.msra.mxu0 %vm736_vm1, %v594_v14  ;;  %365 = vperm.xlu0 %649, %v362_v24  }
  0x18   :  { %602 = vmatprep.subr.msk.bf16.mxu0 %vm736_vm1, %v600_v21 }
  0x1f   :  { %605 = vmatpush3.bf16.xpose.msk.msra.mxu0 %vm736_vm1, %v600_v21 }
  0x20   :  { %608 = vmatprep.subr.msk.bf16.mxu0 %vm736_vm1, %v606_v27 }
  0x27   :  { %611 = vmatpush3.bf16.xpose.msk.msra.mxu0 %vm736_vm1, %v606_v27  ;;  %v368_v27 = vlaneseq }
  0x28   :  { %614 = vmatprep.subr.msk.bf16.mxu0 %vm736_vm1, %v612_v30 }
  0x29   :  { %v369_v28 = vshrl.u32 %v368_v27, 7 }
  0x2b   :  { %v370_v29 = vsub.s32 0, %v369_v28 }
  0x2f   :  { %617 = vmatpush3.bf16.xpose.msk.msra.mxu0 %vm736_vm1, %v612_v30 }
  0x30   :  { %620 = vmatprep.subr.msk.bf16.mxu0 %vm736_vm1, %v618_v33 }
  0x37   :  { %623 = vmatpush3.bf16.xpose.msk.msra.mxu0 %vm736_vm1, %v618_v33 }
  0x38   :  { %626 = vmatprep.subr.msk.bf16.mxu0 %vm736_vm1, %v624_v36 }
  0x3f   :  { %629 = vmatpush3.bf16.xpose.msk.msra.mxu0 %vm736_vm1, %v624_v36 }
  0x46   :  { %552 = vmatmul.mubr.msk.f32.vlgmr.msra.gmra.mrb[0].mxu0 %vm73_vm0, %v46_v37 }
  0x47   :  { %554 = vmatprep.mubr.msk.f32.mxu0 %vm73_vm0, %v47_v38 }
  0x4a   :  { %555 = vmatmul.mubr.msk.f32.gmra.mrb[2].mxu0 %vm73_vm0, %v48_v39 }
  0x85   :  { %v66_v42 = vpop.permute.xlu1 %65 }
  0x86   :  { %v56_v41 = vpop.permute.xlu0 %55 }
  0x89   :  { %v71_v49 = vpop.permute.xlu1 %70 }
  0x8a   :  { %v61_v43 = vpop.permute.xlu0 %60 }
  0x8d   :  { %v243_v4 = vpop.permute.xlu1 %242 }
  0x8e   :  { %v238_v5 = vpop.permute.xlu0 %237 }
  0x91   :  { %v253_v11 = vpop.permute.xlu1 %252 }
  0x92   :  { %v248_v14 = vpop.permute.xlu0 %247 }
  0x96   :  { %v366_v30 = vpop.permute.xlu0 %365 }
  0x97   :  { %v371_v31 = vrot.slane %v366_v30, %v370_v29 }
 0x119   :  { %v553_v44 = vpop.f32.mrb[0].mxu0 }
 0x11a   :  { %v206_v45 = vadd.f32 %v553_v44, %v61_v43  ;;  %v200_v46 = vpop.f32.mrb[1].mxu0 }
 0x11b   :  { %v201_v47 = vadd.f32 %v200_v46, %v56_v41 }
 0x11c   :  { %v220_v48 = vmul.f32 0.01, %v206_v45 }
 0x11d   :  { %v219_v50 = vmul.f32 0.01, %v201_v47  ;;  %v556_v51 = vpop.f32.mrb[2].mxu0 }
 0x11e   :  { %v224_v52 = vmax.f32 %v206_v45, %v220_v48  ;;  %v216_v53 = vadd.f32 %v556_v51, %v71_v49  ;;  %v210_v54 = vpop.f32.mrb[3].mxu0 }
 0x11f   :  { %v223_v55 = vmax.f32 %v201_v47, %v219_v50  ;;  %v211_v56 = vadd.f32 %v210_v54, %v66_v42 }
 0x120   :  { %v222_v57 = vmul.f32 0.01, %v216_v53 }
 0x121   :  { %v221_v58 = vmul.f32 0.01, %v211_v56  ;;  %v630_v59 = vpack.c.bf16 %v224_v52, %v223_v55 }
 0x122   :  { %v226_v60 = vmax.f32 %v216_v53, %v222_v57 }
 0x123   :  { %v225_v61 = vmax.f32 %v211_v56, %v221_v58  ;;  %631 = vmatprep.subr.bf16.mxu1 %v630_v59 }
 0x124   :  { %633 = vmatpush3.bf16.msra.mxu1 %v630_v59 }
 0x125   :  { %v634_v62 = vpack.c.bf16 %v226_v60, %v225_v61 }
 0x127   :  { %635 = vmatprep.subr.bf16.mxu1 %v634_v62 }
 0x128   :  { %637 = vmatpush3.bf16.msra.mxu1 %v634_v62 }
 0x129   :  { %638 = vmatprep.subr.bf16.mxu1 %v678_v2 }
 0x12b   :  { %566 = vmatmul.mubr.msk.f32.vlgmr.msra.gmra.mrb[0].mxu1 %vm255_vm2, %v228_v63 }
 0x12c   :  { %568 = vmatprep.mubr.msk.f32.mxu1 %vm255_vm2, %v229_v0 }
 0x12f   :  { %569 = vmatmul.mubr.msk.f32.gmra.mrb[2].mxu1 %vm255_vm2, %v230_v1 }
 0x130   :  { %579 = vmatprep.mubr.msk.f32.mxu1 %vm679_vm3, %v680_v3 }
 0x1fe   :  { %v567_v6 = vpop.f32.mrb[0].mxu1 }
 0x1ff   :  { %v340_v7 = vadd.f32 %v567_v6, %v243_v4  ;;  %v334_v8 = vpop.f32.mrb[1].mxu1 }
 0x200   :  { %v335_v9 = vadd.f32 %v334_v8, %v238_v5 }
 0x201   :  { %v354_v10 = vmul.f32 0.01, %v340_v7 }
 0x202   :  { %v353_v12 = vmul.f32 0.01, %v335_v9  ;;  %v570_v13 = vpop.f32.mrb[2].mxu1 }
 0x203   :  { %v358_v15 = vmax.f32 %v340_v7, %v354_v10  ;;  %v350_v16 = vadd.f32 %v570_v13, %v253_v11  ;;  %v344_v17 = vpop.f32.mrb[3].mxu1 }
 0x204   :  { %v357_v18 = vmax.f32 %v335_v9, %v353_v12  ;;  %v345_v19 = vadd.f32 %v344_v17, %v248_v14 }
 0x205   :  { %v356_v20 = vmul.f32 0.01, %v350_v16 }
 0x206   :  { %v639_v21 = vpack.c.bf16 %v358_v15, %v357_v18  ;;  %v355_v22 = vmul.f32 0.01, %v345_v19 }
 0x207   :  { %v360_v23 = vmax.f32 %v350_v16, %v356_v20 }
 0x208   :  { %v359_v24 = vmax.f32 %v345_v19, %v355_v22  ;;  %640 = vmatpush3.bf16.msra.mxu1 %v639_v21 }
 0x209   :  { %641 = vmatprep.subr.bf16.mxu1 %v678_v2 }
 0x20a   :  { %v642_v25 = vpack.c.bf16 %v360_v23, %v359_v24 }
 0x20c   :  { %643 = vmatpush3.bf16.msra.mxu1 %v642_v25 }
 0x20f   :  { %580 = vmatmul.mubr.msk.f32.vlgmr.msra.gmra.mrb[4].mxu1 %vm255_vm2, %v361_v26 }
 0x2e2   :  { %v441_v32 = vpop.f32.mrb[4].mxu1 }
 0x2e3   :  { %v442_v33 = vadd.f32 %v441_v32, %v371_v31  ;;  %v581_v34 = vpop.f32.mrb[5].mxu1 }
 0x2e5   :  { %651 = vtanh.f32 %v442_v33 }
 0x2ef   :  { %v652_v35 = vpop.eup %651 }
 0x2f0   :  { %446 = vst [vmem:[#allocation3] sm:$0x1] %v652_v35 }
 0x2f1   :  { %664 = shalt.err (!%p661_p4)
}
 0x2f2   :  { %s665_s18 = scalar_lea.hbm %s890_s7, 16 }
 0x2f3   :  { %p666_p5 = scmp.ne.s32.totalorder %s890_s7, %s665_s18  ;;  %p669_p6 = scmp.lt.u32.totalorder %s665_s18, %s890_s7 }
 0x2f5   :  { %p671_p7 = pnand %p669_p6, %p666_p5 }
 0x2f7   :  { %674 = shalt.err (!%p671_p7)
}
 0x2f8   :  { %456 = dma.vmem_to_hbm [thread:$0]  %s454_s4, 16, %s890_s7, [#allocation4]  }
 0x2f9   :  { %675 = dma.done.wait [#allocation4], 16  }
 0x2fa   :  { %676 = vsyncadd [#allocation4], 4294967280 }
 0x2fb   :  { %460 = vsyncpa [#allocation4], 1 }

</bundles_post_ra>
